<compile_context>
chip_gen: v7x
topology: tpu7x:2x2x1
jax: 0.10.0
libtpu: 0.0.40
codegen_flags: <defaults>
</compile_context>

<pallas_src>
import jax
import jax.numpy as jnp
from jax.experimental import pallas as pl
from jax.experimental.pallas import tpu as pltpu

LANE = 128
_NEG_INF = -1e30
_A_TILE_BUDGET = 16 * 1024 * 1024        # bytes for the double-buffered A tiles
_Y_RESIDENT_BUDGET = 16 * 1024 * 1024    # bytes (incl. buffering slack) for resident Y_rel
_MAX_TILE_M = 1024
_MAX_TILE_K = 2048


def _round_up(x, m):
    return (x + m - 1) // m * m


# ---------------------------------------------------------------------------
# Generation-aware compiler params and tile selection
# ---------------------------------------------------------------------------

_VMEM_LIMIT_CACHE = None


def _vmem_limit_bytes():
    """~75% of the physical VMEM of the current generation (64 MiB on v7x, 128 MiB v5e/v6e)."""
    global _VMEM_LIMIT_CACHE
    if _VMEM_LIMIT_CACHE is None:
        default = 48 * 1024 * 1024
        try:
            cap = getattr(pltpu.get_tpu_info(), "vmem_capacity_bytes", None)
            if cap:
                cap = min(int(cap), 128 * 1024 * 1024)
                _VMEM_LIMIT_CACHE = max(32 * 1024 * 1024, int(cap * 3 // 4))
            else:
                _VMEM_LIMIT_CACHE = default
        except Exception:
            _VMEM_LIMIT_CACHE = default
    return _VMEM_LIMIT_CACHE


def _compiler_params(semantics):
    return pltpu.CompilerParams(dimension_semantics=semantics,
                                vmem_limit_bytes=_vmem_limit_bytes())


def _pick_tile(n_pad, max_tile, prefer_split=False):
    """Largest multiple of 128 that divides n_pad and is <= max_tile."""
    cap = min(max_tile, n_pad)
    if prefer_split and n_pad >= 2 * LANE:
        cap = min(cap, n_pad // 2)   # keep >=2 row tiles so both v7x TensorCores get work
    cap = max(cap, LANE)
    best = LANE
    for t in range(LANE, cap + 1, LANE):
        if n_pad % t == 0:
            best = t
    return best


def _choose_tiles(n_pad):
    tile_m = _pick_tile(n_pad, _MAX_TILE_M, prefer_split=True)
    max_tk = max(LANE, (_A_TILE_BUDGET // (4 * tile_m)) // LANE * LANE)
    tile_k = _pick_tile(n_pad, min(_MAX_TILE_K, max_tk))
    return tile_m, tile_k


# ---------------------------------------------------------------------------
# Pallas kernels
# ---------------------------------------------------------------------------

def xw_transform_kernel(x_ref, w_cat_ref, b_ref, yrel_ref, yroot_ref):
    """Y = X @ [W_rel | W_root] for one row tile; split, add bias to the root half.

    x_ref:     [TM, Fi]     bf16
    w_cat_ref: [Fi, 2*Fo]   bf16
    b_ref:     [1, Fo]      f32
    yrel_ref:  [TM, Fo]     bf16  (neighbor-value stream for the aggregation kernel)
    yroot_ref: [TM, Fo]     f32   (self/root term incl. bias, kept f32 for accuracy)
    """
    y = jnp.dot(x_ref[...], w_cat_ref[...], preferred_element_type=jnp.float32)
    fo = yrel_ref.shape[1]
    yrel_ref[...] = y[:, :fo].astype(yrel_ref.dtype)
    yroot_ref[...] = y[:, fo:] + b_ref[...]


def _neighbor_tile(yrel_ref, a_ref, k):
    """Current contraction tile of Y_rel (Y_rel is either tiled or whole-array VMEM-resident)."""
    tk = a_ref.shape[1]
    if yrel_ref.shape[0] == tk:                 # tiled stream (or single-tile graph)
        return yrel_ref[...]
    start = pl.multiple_of(k * tk, tk)          # resident: slice in place, no re-DMA
    return yrel_ref[pl.ds(start, tk), :]


def aggregate_relu_kernel(a_ref, yrel_ref, yroot_ref, o_ref, acc_ref):
    """H = relu(A @ Y_rel + Y_root) for one (row tile i, contraction tile k) grid step."""
    k = pl.program_id(1)

    @pl.when(k == 0)
    def _init():
        acc_ref[...] = jnp.zeros_like(acc_ref)

    acc_ref[...] += jnp.dot(a_ref[...], _neighbor_tile(yrel_ref, a_ref, k),
                            preferred_element_type=jnp.float32)

    @pl.when(k == pl.num_programs(1) - 1)
    def _finalize():
        o_ref[...] = jnp.maximum(acc_ref[...] + yroot_ref[...], 0.0).astype(o_ref.dtype)


def aggregate_out_logsoftmax_kernel(a_ref, yrel_ref, yroot_ref, w_out_ref, b_out_ref,
                                    o_ref, acc_ref):
    """Last GraphConv + ReLU + output Linear + log_softmax, fused per row tile."""
    k = pl.program_id(1)

    @pl.when(k == 0)
    def _init():
        acc_ref[...] = jnp.zeros_like(acc_ref)

    acc_ref[...] += jnp.dot(a_ref[...], _neighbor_tile(yrel_ref, a_ref, k),
                            preferred_element_type=jnp.float32)

    @pl.when(k == pl.num_programs(1) - 1)
    def _finalize():
        h = jnp.maximum(acc_ref[...] + yroot_ref[...], 0.0)
        # dropout(training=False) is identity.
        logits = jnp.dot(h.astype(jnp.bfloat16), w_out_ref[...],
                         preferred_element_type=jnp.float32) + b_out_ref[...]
        # Padded class lanes carry a -1e30 bias -> exp underflows to 0, so reducing over the
        # full 128-lane slab equals log_softmax over the real classes.
        m = jnp.max(logits, axis=1, keepdims=True)
        shifted = logits - m
        lse = jnp.log(jnp.sum(jnp.exp(shifted), axis=1, keepdims=True))
        o_ref[...] = shifted - lse


# ---------------------------------------------------------------------------
# pallas_call wrappers
# ---------------------------------------------------------------------------

def graphconv_transform(x, w_cat, b, *, tile_m):
    n, f_in = x.shape
    f_out = w_cat.shape[1] // 2
    return pl.pallas_call(
        xw_transform_kernel,
        out_shape=(jax.ShapeDtypeStruct((n, f_out), jnp.bfloat16),
                   jax.ShapeDtypeStruct((n, f_out), jnp.float32)),
        grid_spec=pltpu.PrefetchScalarGridSpec(
            num_scalar_prefetch=0,
            grid=(n // tile_m,),
            in_specs=[
                pl.BlockSpec((tile_m, f_in), lambda i: (i, 0)),
                pl.BlockSpec((f_in, 2 * f_out), lambda i: (0, 0)),
                pl.BlockSpec((1, f_out), lambda i: (0, 0)),
            ],
            out_specs=[
                pl.BlockSpec((tile_m, f_out), lambda i: (i, 0)),
                pl.BlockSpec((tile_m, f_out), lambda i: (i, 0)),
            ],
        ),
        compiler_params=_compiler_params(("parallel",)),
    )(x, w_cat, b)


def _yrel_spec(n, f_out, tile_k, resident):
    if resident:
        # Constant block index -> one DMA, whole Y_rel stays resident in VMEM.
        return pl.BlockSpec((n, f_out), lambda i, k: (0, 0))
    return pl.BlockSpec((tile_k, f_out), lambda i, k: (k, 0))


def aggregate_relu(a, y_rel, y_root, *, tile_m, tile_k, y_resident):
    n = a.shape[0]
    f_out = y_rel.shape[1]
    return pl.pallas_call(
        aggregate_relu_kernel,
        out_shape=jax.ShapeDtypeStruct((n, f_out), jnp.bfloat16),
        grid_spec=pltpu.PrefetchScalarGridSpec(
            num_scalar_prefetch=0,
            grid=(n // tile_m, n // tile_k),
            in_specs=[
                pl.BlockSpec((tile_m, tile_k), lambda i, k: (i, k)),   # A tile
                _yrel_spec(n, f_out, tile_k, y_resident),              # Y_rel
                pl.BlockSpec((tile_m, f_out), lambda i, k: (i, 0)),    # Y_root (once per i)
            ],
            out_specs=pl.BlockSpec((tile_m, f_out), lambda i, k: (i, 0)),
            scratch_shapes=[pltpu.VMEM((tile_m, f_out), jnp.float32)],
        ),
        compiler_params=_compiler_params(("parallel", "arbitrary")),
    )(a, y_rel, y_root)


def aggregate_out_logsoftmax(a, y_rel, y_root, w_out, b_out, *, tile_m, tile_k, y_resident):
    n = a.shape[0]
    f_out = y_rel.shape[1]
    c = w_out.shape[1]
    return pl.pallas_call(
        aggregate_out_logsoftmax_kernel,
        out_shape=jax.ShapeDtypeStruct((n, c), jnp.float32),
        grid_spec=pltpu.PrefetchScalarGridSpec(
            num_scalar_prefetch=0,
            grid=(n // tile_m, n // tile_k),
            in_specs=[
                pl.BlockSpec((tile_m, tile_k), lambda i, k: (i, k)),
                _yrel_spec(n, f_out, tile_k, y_resident),
                pl.BlockSpec((tile_m, f_out), lambda i, k: (i, 0)),
                pl.BlockSpec((f_out, c), lambda i, k: (0, 0)),
                pl.BlockSpec((1, c), lambda i, k: (0, 0)),
            ],
            out_specs=pl.BlockSpec((tile_m, c), lambda i, k: (i, 0)),
            scratch_shapes=[pltpu.VMEM((tile_m, f_out), jnp.float32)],
        ),
        compiler_params=_compiler_params(("parallel", "arbitrary")),
    )(a, y_rel, y_root, w_out, b_out)


# ---------------------------------------------------------------------------
# Glue: densify adjacency, pad params to lane-dense bf16, forward pass
# ---------------------------------------------------------------------------

def build_dense_adjacency(edge_index, edge_weight, n_pad):
    """A[dst, src] += w so (A @ X)[i] = sum_{edges src->i} w * X[src] (PyG 'add' aggr).

    Scatter-accumulate in f32 (multi-edge sums), then cast to bf16 for the MXU.
    # TODO(synk): block-wise build / int8-fp8 quantization to cut peak HBM footprint further.
    """
    src, dst = edge_index[0], edge_index[1]
    a = jnp.zeros((n_pad, n_pad), jnp.float32)
    a = a.at[dst, src].add(edge_weight.astype(jnp.float32))
    return a.astype(jnp.bfloat16)


def _pad2(m, rows, cols, fill=0.0):
    out = jnp.full((rows, cols), fill, jnp.float32)
    return out.at[:m.shape[0], :m.shape[1]].set(m)


def pad_params(params):
    """Pad weights/biases to 128-lane multiples.

    Each GraphConv layer's W_rel and W_root are packed side-by-side into one
    [F_in_pad, 2*F_out_pad] bf16 matrix so the per-layer transform is a single MXU pass.
    Padded class lanes of the output bias are -1e30 so they vanish under log_softmax.
    """
    layers = []
    for (w_rel, w_root, b) in params['layers']:
        f_in, f_out = w_rel.shape
        fi, fo = _round_up(f_in, LANE), _round_up(f_out, LANE)
        w_cat = jnp.zeros((fi, 2 * fo), jnp.float32)
        w_cat = w_cat.at[:f_in, :f_out].set(w_rel)
        w_cat = w_cat.at[:f_in, fo:fo + f_out].set(w_root)
        b_p = jnp.zeros((1, fo), jnp.float32).at[:, :f_out].set(b.reshape(1, -1))
        layers.append((w_cat.astype(jnp.bfloat16), b_p))
    w_out, b_out = params['out']
    f_in, c = w_out.shape
    fi, cp = _round_up(f_in, LANE), _round_up(c, LANE)
    w_out_p = jnp.zeros((fi, cp), jnp.float32).at[:f_in, :c].set(w_out).astype(jnp.bfloat16)
    b_out_p = jnp.full((1, cp), _NEG_INF, jnp.float32).at[:, :c].set(b_out.reshape(1, -1))
    return {'layers': layers, 'out': (w_out_p, b_out_p)}


def graph_conv_net_forward(x, edge_index, edge_weight, params, num_classes):
    """Inference forward pass of GraphConvNet.

    params = {'layers': [(w_rel [Fi,Fh], w_root [Fi,Fh], b [1,Fh]), ...],
              'out':    (w_out [Fh,C], b_out [1,C])}   (logical, f32)
    """
    n, f = x.shape
    n_pad = _round_up(n, LANE)          # pad N to 128, NOT to the tile (A is N_pad^2)
    f_pad = _round_up(f, LANE)
    tile_m, tile_k = _choose_tiles(n_pad)

    a = build_dense_adjacency(edge_index, edge_weight, n_pad)
    h = _pad2(x, n_pad, f_pad).astype(jnp.bfloat16)

    padded = pad_params(params)
    w_out, b_out = padded['out']
    n_layers = len(padded['layers'])

    out = None
    for li, (w_cat, b) in enumerate(padded['layers']):
        f_out = w_cat.shape[1] // 2
        # Keep the whole Y_rel resident in VMEM across the aggregation grid when it fits.
        y_resident = (n_pad * f_out * 2) * 2 <= _Y_RESIDENT_BUDGET
        y_rel, y_root = graphconv_transform(h, w_cat, b, tile_m=tile_m)
        if li < n_layers - 1:
            h = aggregate_relu(a, y_rel, y_root,
                               tile_m=tile_m, tile_k=tile_k, y_resident=y_resident)
            # F.dropout(..., training=False) is identity at inference.
        else:
            out = aggregate_out_logsoftmax(a, y_rel, y_root, w_out, b_out,
                                           tile_m=tile_m, tile_k=tile_k,
                                           y_resident=y_resident)
    return out[:n, :num_classes]


# ---------------------------------------------------------------------------
# Pure-JAX f32 reference (correctness check), param init, demo
# ---------------------------------------------------------------------------

def reference_forward(x, edge_index, edge_weight, params):
    n = x.shape[0]
    src, dst = edge_index[0], edge_index[1]
    a = jnp.zeros((n, n), jnp.float32).at[dst, src].add(edge_weight)
    h = x
    for (w_rel, w_root, b) in params['layers']:
        h = jnp.maximum(a @ h @ w_rel + h @ w_root + b, 0.0)
    w_out, b_out = params['out']
    return jax.nn.log_softmax(h @ w_out + b_out, axis=1)


def init_params(key, num_features, hidden_layers, num_classes):
    layers = []
    dims = [num_features] + list(hidden_layers)
    for i in range(len(hidden_layers)):
        f_in, f_out = dims[i], dims[i + 1]
        key, k1, k2, k3 = jax.random.split(key, 4)
        scale = 1.0 / jnp.sqrt(jnp.float32(f_in))
        w_rel = jax.random.uniform(k1, (f_in, f_out), jnp.float32, -scale, scale)
        w_root = jax.random.uniform(k2, (f_in, f_out), jnp.float32, -scale, scale)
        b = jax.random.uniform(k3, (1, f_out), jnp.float32, -scale, scale)
        layers.append((w_rel, w_root, b))
    f_last = dims[-1]
    key, k1, k2 = jax.random.split(key, 3)
    scale = 1.0 / jnp.sqrt(jnp.float32(f_last))
    w_out = jax.random.uniform(k1, (f_last, num_classes), jnp.float32, -scale, scale)
    b_out = jax.random.uniform(k2, (1, num_classes), jnp.float32, -scale, scale)
    return {'layers': layers, 'out': (w_out, b_out)}


if __name__ == "__main__":
    # Small synthetic graph: N nodes, E directed edges.
    num_nodes = 16
    num_edges = 32
    num_features = 8
    hidden_layers = [32, 16]
    num_classes = 4

    key = jax.random.PRNGKey(0)
    kx, ksrc, kdst, kw, kparams = jax.random.split(key, 5)

    x = jax.random.normal(kx, (num_nodes, num_features), jnp.float32)
    src = jax.random.randint(ksrc, (num_edges,), 0, num_nodes, jnp.int32)
    dst = jax.random.randint(kdst, (num_edges,), 0, num_nodes, jnp.int32)
    edge_index = jnp.stack([src, dst], axis=0)               # [2, E]
    edge_weight = jax.random.uniform(kw, (num_edges,), jnp.float32)

    params = init_params(kparams, num_features, hidden_layers, num_classes)

    fwd = jax.jit(graph_conv_net_forward, static_argnames=("num_classes",))
    out = fwd(x, edge_index, edge_weight, params, num_classes=num_classes)
    out = jax.block_until_ready(out)

    assert out.shape == (num_nodes, num_classes)
    # rows of log_softmax should exp-sum to ~1
    assert bool(jnp.all(jnp.abs(jnp.sum(jnp.exp(out), axis=1) - 1.0) < 1e-3))
    # compare against a pure-JAX f32 reference (bf16 matmul inputs -> loose tolerance)
    ref = reference_forward(x, edge_index, edge_weight, params)
    err = float(jnp.max(jnp.abs(out - ref)))
    assert err < 1e-1, err
    print("KERNEL_OK")
</pallas_src>

<mosaic_0001>
module attributes {stable_mosaic.version = 11 : i64} {
  func.func private @main(%arg0: i32) attributes {dimension_semantics = [#tpu.dimension_semantics<core_parallel>], iteration_bounds = array<i64: 2>, tpu.core_type = #tpu.core_type<sc_scalar_subcore>, window_params = []} {
    return
  }
}

module attributes {stable_mosaic.version = 11 : i64} {
  func.func private @main(%arg0: i32) attributes {dimension_semantics = [#tpu.dimension_semantics<core_parallel>], iteration_bounds = array<i64: 2>, tpu.core_type = #tpu.core_type<sc_scalar_subcore>, window_params = []} {
    return
  }
}

module attributes {stable_mosaic.version = 11 : i64} {
  func.func @xw_transform_kernel(%arg0: i32, %arg1: memref<128x128xbf16, #tpu.memory_space<vmem>>, %arg2: memref<128x256xbf16, #tpu.memory_space<vmem>>, %arg3: memref<1x128xf32, #tpu.memory_space<vmem>>, %arg4: memref<128x128xbf16, #tpu.memory_space<vmem>>, %arg5: memref<128x128xf32, #tpu.memory_space<vmem>>) attributes {dimension_semantics = [#tpu.dimension_semantics<parallel>], iteration_bounds = array<i64: 1>, scalar_prefetch = 0 : i64, scratch_operands = 0 : i64, tpu.core_type = #tpu.core_type<tc>, window_params = [{transform_indices = @transform_0, window_bounds = array<i64: 128, 128>}, {pipeline_mode = #tpu.pipeline_mode<synchronous>, transform_indices = @transform_1, window_bounds = array<i64: 128, 256>}, {pipeline_mode = #tpu.pipeline_mode<synchronous>, transform_indices = @transform_2, window_bounds = array<i64: 1, 128>}, {transform_indices = @transform_3, window_bounds = array<i64: 128, 128>}, {transform_indices = @transform_4, window_bounds = array<i64: 128, 128>}]} {
    %c0 = arith.constant 0 : index
    %c0_0 = arith.constant 0 : index
    %0 = vector.load %arg1[%c0, %c0_0] : memref<128x128xbf16, #tpu.memory_space<vmem>>, vector<128x128xbf16>
    %c0_1 = arith.constant 0 : index
    %c0_2 = arith.constant 0 : index
    %1 = vector.load %arg2[%c0_1, %c0_2] : memref<128x256xbf16, #tpu.memory_space<vmem>>, vector<128x256xbf16>
    %cst = arith.constant dense<0.000000e+00> : vector<128x256xf32>
    %2 = tpu.matmul %0, %1, %cst {dimension_numbers = #tpu.dot_dimension_numbers<[1], [0], [0], [1], [0, 0, 1, 1], [], []>} : vector<128x128xbf16>, vector<128x256xbf16>, vector<128x256xf32> -> vector<128x256xf32>
    %3 = vector.extract_strided_slice %2 {offsets = [0, 0], sizes = [128, 128], strides = [1, 1]} : vector<128x256xf32> to vector<128x128xf32>
    %4 = arith.truncf %3 : vector<128x128xf32> to vector<128x128xbf16>
    %c0_3 = arith.constant 0 : index
    %c0_4 = arith.constant 0 : index
    %5 = vector.load %arg4[%c0_3, %c0_4] : memref<128x128xbf16, #tpu.memory_space<vmem>>, vector<128x128xbf16>
    tpu.vector_store %arg4[%c0_3, %c0_4], %4 {strides = array<i32>} : memref<128x128xbf16, #tpu.memory_space<vmem>>, vector<128x128xbf16>,
    %6 = vector.extract_strided_slice %2 {offsets = [0, 128], sizes = [128, 128], strides = [1, 1]} : vector<128x256xf32> to vector<128x128xf32>
    %c0_5 = arith.constant 0 : index
    %c0_6 = arith.constant 0 : index
    %7 = vector.load %arg3[%c0_5, %c0_6] : memref<1x128xf32, #tpu.memory_space<vmem>>, vector<1x128xf32>
    %8 = vector.broadcast %7 : vector<1x128xf32> to vector<128x128xf32>
    %9 = arith.addf %6, %8 : vector<128x128xf32>
    %c0_7 = arith.constant 0 : index
    %c0_8 = arith.constant 0 : index
    %10 = vector.load %arg5[%c0_7, %c0_8] : memref<128x128xf32, #tpu.memory_space<vmem>>, vector<128x128xf32>
    tpu.vector_store %arg5[%c0_7, %c0_8], %9 {strides = array<i32>} : memref<128x128xf32, #tpu.memory_space<vmem>>, vector<128x128xf32>,
    return
  }
  func.func @transform_0(%arg0: i32) -> (i32, i32) {
    %c0_i32 = arith.constant 0 : i32
    %c0_i32_0 = arith.constant 0 : i32
    return %arg0, %c0_i32 : i32, i32
  }
  func.func @transform_1(%arg0: i32) -> (i32, i32) {
    %c0_i32 = arith.constant 0 : i32
    %c0_i32_0 = arith.constant 0 : i32
    %c0_i32_1 = arith.constant 0 : i32
    return %c0_i32, %c0_i32_0 : i32, i32
  }
  func.func @transform_2(%arg0: i32) -> (i32, i32) {
    %c0_i32 = arith.constant 0 : i32
    %c0_i32_0 = arith.constant 0 : i32
    %c0_i32_1 = arith.constant 0 : i32
    return %c0_i32, %c0_i32_0 : i32, i32
  }
  func.func @transform_3(%arg0: i32) -> (i32, i32) {
    %c0_i32 = arith.constant 0 : i32
    %c0_i32_0 = arith.constant 0 : i32
    return %arg0, %c0_i32 : i32, i32
  }
  func.func @transform_4(%arg0: i32) -> (i32, i32) {
    %c0_i32 = arith.constant 0 : i32
    %c0_i32_0 = arith.constant 0 : i32
    return %arg0, %c0_i32 : i32, i32
  }
}

module attributes {stable_mosaic.version = 11 : i64} {
  func.func @aggregate_relu_kernel(%arg0: i32, %arg1: i32, %arg2: memref<128x128xbf16, #tpu.memory_space<vmem>>, %arg3: memref<128x128xbf16, #tpu.memory_space<vmem>>, %arg4: memref<128x128xf32, #tpu.memory_space<vmem>>, %arg5: memref<128x128xbf16, #tpu.memory_space<vmem>>, %arg6: memref<128x128xf32, #tpu.memory_space<vmem>>) attributes {dimension_semantics = [#tpu.dimension_semantics<parallel>, #tpu.dimension_semantics<arbitrary>], iteration_bounds = array<i64: 1, 1>, scalar_prefetch = 0 : i64, scratch_operands = 1 : i64, tpu.core_type = #tpu.core_type<tc>, window_params = [{transform_indices = @transform_0, window_bounds = array<i64: 128, 128>}, {pipeline_mode = #tpu.pipeline_mode<synchronous>, transform_indices = @transform_1, window_bounds = array<i64: 128, 128>}, {transform_indices = @transform_2, window_bounds = array<i64: 128, 128>}, {transform_indices = @transform_3, window_bounds = array<i64: 128, 128>}]} {
    %c0_i32 = arith.constant 0 : i32
    %0 = arith.cmpi eq, %arg1, %c0_i32 : i32
    %1 = arith.extui %0 : i1 to i32
    %c0_i32_0 = arith.constant 0 : i32
    %2 = arith.cmpi ne, %1, %c0_i32_0 : i32
    scf.if %2 {
      %cst_10 = arith.constant 0.000000e+00 : f32
      %12 = vector.broadcast %cst_10 : f32 to vector<128x128xf32>
      %c0_11 = arith.constant 0 : index
      %c0_12 = arith.constant 0 : index
      %13 = vector.load %arg6[%c0_11, %c0_12] : memref<128x128xf32, #tpu.memory_space<vmem>>, vector<128x128xf32>
      tpu.vector_store %arg6[%c0_11, %c0_12], %12 {strides = array<i32>} : memref<128x128xf32, #tpu.memory_space<vmem>>, vector<128x128xf32>,
    } else {
    }
    %c0 = arith.constant 0 : index
    %c0_1 = arith.constant 0 : index
    %3 = vector.load %arg6[%c0, %c0_1] : memref<128x128xf32, #tpu.memory_space<vmem>>, vector<128x128xf32>
    %c0_2 = arith.constant 0 : index
    %c0_3 = arith.constant 0 : index
    %4 = vector.load %arg2[%c0_2, %c0_3] : memref<128x128xbf16, #tpu.memory_space<vmem>>, vector<128x128xbf16>
    %c0_4 = arith.constant 0 : index
    %c0_5 = arith.constant 0 : index
    %5 = vector.load %arg3[%c0_4, %c0_5] : memref<128x128xbf16, #tpu.memory_space<vmem>>, vector<128x128xbf16>
    %cst = arith.constant dense<0.000000e+00> : vector<128x128xf32>
    %6 = tpu.matmul %4, %5, %cst {dimension_numbers = #tpu.dot_dimension_numbers<[1], [0], [0], [1], [0, 0, 1, 1], [], []>} : vector<128x128xbf16>, vector<128x128xbf16>, vector<128x128xf32> -> vector<128x128xf32>
    %7 = arith.addf %3, %6 : vector<128x128xf32>
    %c0_6 = arith.constant 0 : index
    %c0_7 = arith.constant 0 : index
    %8 = vector.load %arg6[%c0_6, %c0_7] : memref<128x128xf32, #tpu.memory_space<vmem>>, vector<128x128xf32>
    tpu.vector_store %arg6[%c0_6, %c0_7], %7 {strides = array<i32>} : memref<128x128xf32, #tpu.memory_space<vmem>>, vector<128x128xf32>,
    %c0_i32_8 = arith.constant 0 : i32
    %9 = arith.cmpi eq, %arg1, %c0_i32_8 : i32
    %10 = arith.extui %9 : i1 to i32
    %c0_i32_9 = arith.constant 0 : i32
    %11 = arith.cmpi ne, %10, %c0_i32_9 : i32
    scf.if %11 {
      %c0_10 = arith.constant 0 : index
      %c0_11 = arith.constant 0 : index
      %12 = vector.load %arg6[%c0_10, %c0_11] : memref<128x128xf32, #tpu.memory_space<vmem>>, vector<128x128xf32>
      %c0_12 = arith.constant 0 : index
      %c0_13 = arith.constant 0 : index
      %13 = vector.load %arg4[%c0_12, %c0_13] : memref<128x128xf32, #tpu.memory_space<vmem>>, vector<128x128xf32>
      %14 = arith.addf %12, %13 : vector<128x128xf32>
      %cst_14 = arith.constant 0.000000e+00 : f32
      %15 = vector.broadcast %cst_14 : f32 to vector<128x128xf32>
      %16 = arith.maximumf %14, %15 : vector<128x128xf32>
      %17 = arith.truncf %16 : vector<128x128xf32> to vector<128x128xbf16>
      %c0_15 = arith.constant 0 : index
      %c0_16 = arith.constant 0 : index
      %18 = vector.load %arg5[%c0_15, %c0_16] : memref<128x128xbf16, #tpu.memory_space<vmem>>, vector<128x128xbf16>
      tpu.vector_store %arg5[%c0_15, %c0_16], %17 {strides = array<i32>} : memref<128x128xbf16, #tpu.memory_space<vmem>>, vector<128x128xbf16>,
    } else {
    }
    return
  }
  func.func @transform_0(%arg0: i32, %arg1: i32) -> (i32, i32) {
    %c0_i32 = arith.constant 0 : i32
    return %arg0, %arg1 : i32, i32
  }
  func.func @transform_1(%arg0: i32, %arg1: i32) -> (i32, i32) {
    %c0_i32 = arith.constant 0 : i32
    %c0_i32_0 = arith.constant 0 : i32
    %c0_i32_1 = arith.constant 0 : i32
    return %c0_i32, %c0_i32_0 : i32, i32
  }
  func.func @transform_2(%arg0: i32, %arg1: i32) -> (i32, i32) {
    %c0_i32 = arith.constant 0 : i32
    %c0_i32_0 = arith.constant 0 : i32
    return %arg0, %c0_i32 : i32, i32
  }
  func.func @transform_3(%arg0: i32, %arg1: i32) -> (i32, i32) {
    %c0_i32 = arith.constant 0 : i32
    %c0_i32_0 = arith.constant 0 : i32
    return %arg0, %c0_i32 : i32, i32
  }
}

module attributes {stable_mosaic.version = 11 : i64} {
  func.func @aggregate_out_logsoftmax_kernel(%arg0: i32, %arg1: i32, %arg2: memref<128x128xbf16, #tpu.memory_space<vmem>>, %arg3: memref<128x128xbf16, #tpu.memory_space<vmem>>, %arg4: memref<128x128xf32, #tpu.memory_space<vmem>>, %arg5: memref<128x128xbf16, #tpu.memory_space<vmem>>, %arg6: memref<1x128xf32, #tpu.memory_space<vmem>>, %arg7: memref<128x128xf32, #tpu.memory_space<vmem>>, %arg8: memref<128x128xf32, #tpu.memory_space<vmem>>) attributes {dimension_semantics = [#tpu.dimension_semantics<parallel>, #tpu.dimension_semantics<arbitrary>], iteration_bounds = array<i64: 1, 1>, scalar_prefetch = 0 : i64, scratch_operands = 1 : i64, tpu.core_type = #tpu.core_type<tc>, window_params = [{transform_indices = @transform_0, window_bounds = array<i64: 128, 128>}, {pipeline_mode = #tpu.pipeline_mode<synchronous>, transform_indices = @transform_1, window_bounds = array<i64: 128, 128>}, {transform_indices = @transform_2, window_bounds = array<i64: 128, 128>}, {pipeline_mode = #tpu.pipeline_mode<synchronous>, transform_indices = @transform_3, window_bounds = array<i64: 128, 128>}, {pipeline_mode = #tpu.pipeline_mode<synchronous>, transform_indices = @transform_4, window_bounds = array<i64: 1, 128>}, {transform_indices = @transform_5, window_bounds = array<i64: 128, 128>}]} {
    %c0_i32 = arith.constant 0 : i32
    %0 = arith.cmpi eq, %arg1, %c0_i32 : i32
    %1 = arith.extui %0 : i1 to i32
    %c0_i32_0 = arith.constant 0 : i32
    %2 = arith.cmpi ne, %1, %c0_i32_0 : i32
    scf.if %2 {
      %cst_10 = arith.constant 0.000000e+00 : f32
      %12 = vector.broadcast %cst_10 : f32 to vector<128x128xf32>
      %c0_11 = arith.constant 0 : index
      %c0_12 = arith.constant 0 : index
      %13 = vector.load %arg8[%c0_11, %c0_12] : memref<128x128xf32, #tpu.memory_space<vmem>>, vector<128x128xf32>
      tpu.vector_store %arg8[%c0_11, %c0_12], %12 {strides = array<i32>} : memref<128x128xf32, #tpu.memory_space<vmem>>, vector<128x128xf32>,
    } else {
    }
    %c0 = arith.constant 0 : index
    %c0_1 = arith.constant 0 : index
    %3 = vector.load %arg8[%c0, %c0_1] : memref<128x128xf32, #tpu.memory_space<vmem>>, vector<128x128xf32>
    %c0_2 = arith.constant 0 : index
    %c0_3 = arith.constant 0 : index
    %4 = vector.load %arg2[%c0_2, %c0_3] : memref<128x128xbf16, #tpu.memory_space<vmem>>, vector<128x128xbf16>
    %c0_4 = arith.constant 0 : index
    %c0_5 = arith.constant 0 : index
    %5 = vector.load %arg3[%c0_4, %c0_5] : memref<128x128xbf16, #tpu.memory_space<vmem>>, vector<128x128xbf16>
    %cst = arith.constant dense<0.000000e+00> : vector<128x128xf32>
    %6 = tpu.matmul %4, %5, %cst {dimension_numbers = #tpu.dot_dimension_numbers<[1], [0], [0], [1], [0, 0, 1, 1], [], []>} : vector<128x128xbf16>, vector<128x128xbf16>, vector<128x128xf32> -> vector<128x128xf32>
    %7 = arith.addf %3, %6 : vector<128x128xf32>
    %c0_6 = arith.constant 0 : index
    %c0_7 = arith.constant 0 : index
    %8 = vector.load %arg8[%c0_6, %c0_7] : memref<128x128xf32, #tpu.memory_space<vmem>>, vector<128x128xf32>
    tpu.vector_store %arg8[%c0_6, %c0_7], %7 {strides = array<i32>} : memref<128x128xf32, #tpu.memory_space<vmem>>, vector<128x128xf32>,
    %c0_i32_8 = arith.constant 0 : i32
    %9 = arith.cmpi eq, %arg1, %c0_i32_8 : i32
    %10 = arith.extui %9 : i1 to i32
    %c0_i32_9 = arith.constant 0 : i32
    %11 = arith.cmpi ne, %10, %c0_i32_9 : i32
    scf.if %11 {
      %c0_10 = arith.constant 0 : index
      %c0_11 = arith.constant 0 : index
      %12 = vector.load %arg8[%c0_10, %c0_11] : memref<128x128xf32, #tpu.memory_space<vmem>>, vector<128x128xf32>
      %c0_12 = arith.constant 0 : index
      %c0_13 = arith.constant 0 : index
      %13 = vector.load %arg4[%c0_12, %c0_13] : memref<128x128xf32, #tpu.memory_space<vmem>>, vector<128x128xf32>
      %14 = arith.addf %12, %13 : vector<128x128xf32>
      %cst_14 = arith.constant 0.000000e+00 : f32
      %15 = vector.broadcast %cst_14 : f32 to vector<128x128xf32>
      %16 = arith.maximumf %14, %15 : vector<128x128xf32>
      %17 = arith.truncf %16 : vector<128x128xf32> to vector<128x128xbf16>
      %c0_15 = arith.constant 0 : index
      %c0_16 = arith.constant 0 : index
      %18 = vector.load %arg5[%c0_15, %c0_16] : memref<128x128xbf16, #tpu.memory_space<vmem>>, vector<128x128xbf16>
      %cst_17 = arith.constant dense<0.000000e+00> : vector<128x128xf32>
      %19 = tpu.matmul %17, %18, %cst_17 {dimension_numbers = #tpu.dot_dimension_numbers<[1], [0], [0], [1], [0, 0, 1, 1], [], []>} : vector<128x128xbf16>, vector<128x128xbf16>, vector<128x128xf32> -> vector<128x128xf32>
      %c0_18 = arith.constant 0 : index
      %c0_19 = arith.constant 0 : index
      %20 = vector.load %arg6[%c0_18, %c0_19] : memref<1x128xf32, #tpu.memory_space<vmem>>, vector<1x128xf32>
      %21 = vector.broadcast %20 : vector<1x128xf32> to vector<128x128xf32>
      %22 = arith.addf %19, %21 : vector<128x128xf32>
      %cst_20 = arith.constant dense<0xFF800000> : vector<128xf32>
      %23 = vector.multi_reduction <maximumf>, %22, %cst_20 [1] : vector<128x128xf32> to vector<128xf32>
      %24 = vector.shape_cast %23 : vector<128xf32> to vector<128x1xf32>
      %25 = vector.broadcast %24 : vector<128x1xf32> to vector<128x128xf32>
      %26 = arith.subf %22, %25 : vector<128x128xf32>
      %27 = math.exp %26 : vector<128x128xf32>
      %cst_21 = arith.constant dense<0.000000e+00> : vector<128xf32>
      %28 = vector.multi_reduction <add>, %27, %cst_21 [1] : vector<128x128xf32> to vector<128xf32>
      %29 = vector.shape_cast %28 : vector<128xf32> to vector<128x1xf32>
      %30 = math.log %29 : vector<128x1xf32>
      %31 = vector.broadcast %30 : vector<128x1xf32> to vector<128x128xf32>
      %32 = arith.subf %26, %31 : vector<128x128xf32>
      %c0_22 = arith.constant 0 : index
      %c0_23 = arith.constant 0 : index
      %33 = vector.load %arg7[%c0_22, %c0_23] : memref<128x128xf32, #tpu.memory_space<vmem>>, vector<128x128xf32>
      tpu.vector_store %arg7[%c0_22, %c0_23], %32 {strides = array<i32>} : memref<128x128xf32, #tpu.memory_space<vmem>>, vector<128x128xf32>,
    } else {
    }
    return
  }
  func.func @transform_0(%arg0: i32, %arg1: i32) -> (i32, i32) {
    %c0_i32 = arith.constant 0 : i32
    return %arg0, %arg1 : i32, i32
  }
  func.func @transform_1(%arg0: i32, %arg1: i32) -> (i32, i32) {
    %c0_i32 = arith.constant 0 : i32
    %c0_i32_0 = arith.constant 0 : i32
    %c0_i32_1 = arith.constant 0 : i32
    return %c0_i32, %c0_i32_0 : i32, i32
  }
  func.func @transform_2(%arg0: i32, %arg1: i32) -> (i32, i32) {
    %c0_i32 = arith.constant 0 : i32
    %c0_i32_0 = arith.constant 0 : i32
    return %arg0, %c0_i32 : i32, i32
  }
  func.func @transform_3(%arg0: i32, %arg1: i32) -> (i32, i32) {
    %c0_i32 = arith.constant 0 : i32
    %c0_i32_0 = arith.constant 0 : i32
    %c0_i32_1 = arith.constant 0 : i32
    return %c0_i32, %c0_i32_0 : i32, i32
  }
  func.func @transform_4(%arg0: i32, %arg1: i32) -> (i32, i32) {
    %c0_i32 = arith.constant 0 : i32
    %c0_i32_0 = arith.constant 0 : i32
    %c0_i32_1 = arith.constant 0 : i32
    return %c0_i32, %c0_i32_0 : i32, i32
  }
  func.func @transform_5(%arg0: i32, %arg1: i32) -> (i32, i32) {
    %c0_i32 = arith.constant 0 : i32
    %c0_i32_0 = arith.constant 0 : i32
    return %arg0, %c0_i32 : i32, i32
  }
}

</mosaic_0001>

<bundles_post_ra>
// kernel: graph_conv_net_forward.4
= control target key start
LH: loop header
LB: loop body
LE: loop exit
PB: predicated region body
PF: predicated region fallthrough
CT: control target
= control target key end

     0   :  { %v570_v1 = vmov 0   ;;  %s769_s1 = inlined_call_operand.vmem [shape: bf16[128,256], index: 1, kind: input, shape index: {}]   ;;  %s770_s0 = inlined_call_operand.vmem [shape: bf16[128,128], index: 0, kind: input, shape index: {}]   ;;  %s771_s2 = inlined_call_operand.vmem [shape: f32[1,128], index: 2, kind: input, shape index: {}]   ;;  %s772_s4 = inlined_call_operand.vmem [shape: f32[128,128], index: 4, kind: output, shape index: {1}]   ;;  %s773_s3 = inlined_call_operand.vmem [shape: bf16[128,128], index: 3, kind: output, shape index: {0}]  }
   0x1   :  { %v538_v0 = vld [vmem:[%s769_s1 + $0x4] ss:$8 sps:$4 sm:$0xff]   ;;  %209 = vmatprep.mubr.bf16.mxu0 %v570_v1  ;;  %249 = vmatprep.mubr.bf16.mxu1 %v570_v1  ;;  %v540_v2 = vld [vmem:[%s769_s1] ss:$8 sps:$4 sm:$0xff]   ;;  %v541_v3 = vld [vmem:[%s769_s1 + $0x14] ss:$8 sps:$4 sm:$0xff]  }
   0x2   :  { %177 = vmatprep.subr.bf16.mxu0 %v538_v0  ;;  %521 = vmatprep.subr.bf16.mxu1 %v538_v0  ;;  %v543_v4 = vld [vmem:[%s769_s1 + $0x10] ss:$8 sps:$4 sm:$0xff]   ;;  %v544_v5 = vld [vmem:[%s769_s1 + $0x24] ss:$8 sps:$4 sm:$0xff]   ;;  %v546_v6 = vld [vmem:[%s769_s1 + $0x20] ss:$8 sps:$4 sm:$0xff]  }
   0x3   :  { %178 = vmatpush1.bf16.msra.mxu0 %v540_v2  ;;  %529 = vmatpush1.bf16.msra.mxu1 %v540_v2  ;;  %v547_v7 = vld [vmem:[%s769_s1 + $0x34] ss:$8 sps:$4 sm:$0xff]   ;;  %v549_v8 = vld [vmem:[%s769_s1 + $0x30] ss:$8 sps:$4 sm:$0xff]   ;;  %v550_v9 = vld [vmem:[%s769_s1 + $0x44] ss:$8 sps:$4 sm:$0xff]  }
   0x4   :  { %179 = vmatprep.subr.bf16.mxu0 %v541_v3  ;;  %522 = vmatprep.subr.bf16.mxu1 %v541_v3  ;;  %v552_v10 = vld [vmem:[%s769_s1 + $0x40] ss:$8 sps:$4 sm:$0xff]   ;;  %v553_v11 = vld [vmem:[%s769_s1 + $0x54] ss:$8 sps:$4 sm:$0xff]   ;;  %v555_v12 = vld [vmem:[%s769_s1 + $0x50] ss:$8 sps:$4 sm:$0xff]  }
   0x5   :  { %v556_v13 = vld [vmem:[%s769_s1 + $0x64] ss:$8 sps:$4 sm:$0xff]   ;;  %v558_v14 = vld [vmem:[%s769_s1 + $0x60] ss:$8 sps:$4 sm:$0xff]   ;;  %v559_v15 = vld [vmem:[%s769_s1 + $0x74] ss:$8 sps:$4 sm:$0xff]  }
   0x6   :  { %v561_v16 = vld [vmem:[%s769_s1 + $0x70] ss:$8 sps:$4 sm:$0xff]   ;;  %v562_v17 = vld [vmem:[%s770_s0] sm:$0xff]   ;;  %v564_v19 = vld [vmem:[%s770_s0 + $0x8] sm:$0xff]  }
   0x7   :  { %180 = vmatpush1.bf16.msra.mxu0 %v543_v4  ;;  %530 = vmatpush1.bf16.msra.mxu1 %v543_v4  ;;  %v563_v18 = vld [vmem:[%s770_s0 + $0x20] sm:$0xff]   ;;  %v565_v20 = vld [vmem:[%s770_s0 + $0x28] sm:$0xff]   ;;  %v566_v21 = vld [vmem:[%s770_s0 + $0x10] sm:$0xff]  }
   0x8   :  { %181 = vmatprep.subr.bf16.mxu0 %v544_v5  ;;  %523 = vmatprep.subr.bf16.mxu1 %v544_v5  ;;  %v567_v22 = vld [vmem:[%s770_s0 + $0x30] sm:$0xff]   ;;  %v568_v23 = vld [vmem:[%s770_s0 + $0x18] sm:$0xff]   ;;  %v679_v25 = vld [vmem:[%s771_s2] ss:$0 sm:$0xff] }
   0x9   :  { %v569_v24 = vld [vmem:[%s770_s0 + $0x38] sm:$0xff]  }
   0xb   :  { %182 = vmatpush1.bf16.msra.mxu0 %v546_v6  ;;  %531 = vmatpush1.bf16.msra.mxu1 %v546_v6 }
   0xc   :  { %183 = vmatprep.subr.bf16.mxu0 %v547_v7  ;;  %524 = vmatprep.subr.bf16.mxu1 %v547_v7 }
   0xf   :  { %184 = vmatpush1.bf16.msra.mxu0 %v549_v8  ;;  %532 = vmatpush1.bf16.msra.mxu1 %v549_v8 }
  0x10   :  { %185 = vmatprep.subr.bf16.mxu0 %v550_v9  ;;  %525 = vmatprep.subr.bf16.mxu1 %v550_v9 }
  0x13   :  { %186 = vmatpush1.bf16.msra.mxu0 %v552_v10  ;;  %533 = vmatpush1.bf16.msra.mxu1 %v552_v10 }
  0x14   :  { %187 = vmatprep.subr.bf16.mxu0 %v553_v11  ;;  %526 = vmatprep.subr.bf16.mxu1 %v553_v11 }
  0x17   :  { %188 = vmatpush1.bf16.msra.mxu0 %v555_v12  ;;  %534 = vmatpush1.bf16.msra.mxu1 %v555_v12 }
  0x18   :  { %189 = vmatprep.subr.bf16.mxu0 %v556_v13  ;;  %527 = vmatprep.subr.bf16.mxu1 %v556_v13 }
  0x1b   :  { %190 = vmatpush1.bf16.msra.mxu0 %v558_v14  ;;  %535 = vmatpush1.bf16.msra.mxu1 %v558_v14 }
  0x1c   :  { %191 = vmatprep.subr.bf16.mxu0 %v559_v15  ;;  %528 = vmatprep.subr.bf16.mxu1 %v559_v15 }
  0x1f   :  { %192 = vmatpush1.bf16.msra.mxu0 %v561_v16  ;;  %536 = vmatpush1.bf16.msra.mxu1 %v561_v16 }
  0x22   :  { %210 = vmatmul.mubr.bf16.vlgmr.msra.gmra.mrb[0].mxu0 %v562_v17  ;;  %250 = vmatmul.mubr.bf16.vlgmr.msra.gmra.mrb[0].mxu1 %v563_v18 }
  0x23   :  { %219 = vmatprep.mubr.bf16.mxu0 %v570_v1  ;;  %259 = vmatprep.mubr.bf16.mxu1 %v570_v1 }
  0x2a   :  { %220 = vmatmul.mubr.bf16.gmra.mrb[4].mxu0 %v564_v19  ;;  %260 = vmatmul.mubr.bf16.gmra.mrb[4].mxu1 %v565_v20 }
  0x2b   :  { %229 = vmatprep.mubr.bf16.mxu0 %v570_v1  ;;  %269 = vmatprep.mubr.bf16.mxu1 %v570_v1 }
  0x32   :  { %230 = vmatmul.mubr.bf16.gmra.mrb[8].mxu0 %v566_v21  ;;  %270 = vmatmul.mubr.bf16.gmra.mrb[8].mxu1 %v567_v22 }
  0x33   :  { %239 = vmatprep.mubr.bf16.mxu0 %v570_v1  ;;  %279 = vmatprep.mubr.bf16.mxu1 %v570_v1 }
  0x3a   :  { %240 = vmatmul.mubr.bf16.gmra.mrb[12].mxu0 %v568_v23  ;;  %280 = vmatmul.mubr.bf16.gmra.mrb[12].mxu1 %v569_v24 }
  0xf5   :  { %v211_v26 = vpop.f32.mrb[0].mxu0  ;;  %v251_v27 = vpop.f32.mrb[0].mxu1 }
  0xf6   :  { %v213_v28 = vpop.f32.mrb[1].mxu0  ;;  %v253_v29 = vpop.f32.mrb[1].mxu1 }
  0xf7   :  { %v377_v30 = vadd.f32 %v679_v25, %v213_v28  ;;  %v385_v31 = vadd.f32 %v679_v25, %v253_v29  ;;  %v215_v32 = vpop.f32.mrb[2].mxu0  ;;  %v255_v33 = vpop.f32.mrb[2].mxu1 }
  0xf8   :  { %v477_v34 = vpack.c.bf16 %v215_v32, %v211_v26  ;;  %v497_v35 = vpack.c.bf16 %v255_v33, %v251_v27  ;;  %v217_v36 = vpop.f32.mrb[3].mxu0  ;;  %v257_v37 = vpop.f32.mrb[3].mxu1 }
  0xf9   :  { %393 = vst [vmem:[%s772_s4] sm:$0xff] %v377_v30  ;;  %401 = vst [vmem:[%s772_s4 + $0x40] sm:$0xff] %v385_v31  ;;  %v378_v38 = vadd.f32 %v679_v25, %v217_v36  ;;  %v386_v39 = vadd.f32 %v679_v25, %v257_v37 }
  0xfa   :  { %478 = vst [vmem:[%s773_s3] sm:$0xff] %v477_v34   ;;  %517 = vst [vmem:[%s773_s3 + $0x20] sm:$0xff] %v497_v35  }
  0xfb   :  { %394 = vst [vmem:[%s772_s4 + $0x8] sm:$0xff] %v378_v38  ;;  %402 = vst [vmem:[%s772_s4 + $0x48] sm:$0xff] %v386_v39 }
  0xfd   :  { %v221_v40 = vpop.f32.mrb[4].mxu0  ;;  %v261_v41 = vpop.f32.mrb[4].mxu1 }
  0xfe   :  { %v223_v42 = vpop.f32.mrb[5].mxu0  ;;  %v263_v43 = vpop.f32.mrb[5].mxu1 }
  0xff   :  { %v379_v44 = vadd.f32 %v679_v25, %v223_v42  ;;  %v387_v45 = vadd.f32 %v679_v25, %v263_v43  ;;  %v225_v46 = vpop.f32.mrb[6].mxu0  ;;  %v265_v47 = vpop.f32.mrb[6].mxu1 }
 0x100   :  { %v482_v48 = vpack.c.bf16 %v225_v46, %v221_v40  ;;  %v502_v49 = vpack.c.bf16 %v265_v47, %v261_v41  ;;  %v227_v50 = vpop.f32.mrb[7].mxu0  ;;  %v267_v51 = vpop.f32.mrb[7].mxu1 }
 0x101   :  { %395 = vst [vmem:[%s772_s4 + $0x10] sm:$0xff] %v379_v44  ;;  %403 = vst [vmem:[%s772_s4 + $0x50] sm:$0xff] %v387_v45  ;;  %v380_v52 = vadd.f32 %v679_v25, %v227_v50  ;;  %v388_v53 = vadd.f32 %v679_v25, %v267_v51 }
 0x102   :  { %514 = vst [vmem:[%s773_s3 + $0x8] sm:$0xff] %v482_v48   ;;  %518 = vst [vmem:[%s773_s3 + $0x28] sm:$0xff] %v502_v49  }
 0x103   :  { %396 = vst [vmem:[%s772_s4 + $0x18] sm:$0xff] %v380_v52  ;;  %404 = vst [vmem:[%s772_s4 + $0x58] sm:$0xff] %v388_v53 }
 0x105   :  { %v231_v54 = vpop.f32.mrb[8].mxu0  ;;  %v271_v55 = vpop.f32.mrb[8].mxu1 }
 0x106   :  { %v233_v56 = vpop.f32.mrb[9].mxu0  ;;  %v273_v57 = vpop.f32.mrb[9].mxu1 }
 0x107   :  { %v381_v58 = vadd.f32 %v679_v25, %v233_v56  ;;  %v389_v59 = vadd.f32 %v679_v25, %v273_v57  ;;  %v235_v60 = vpop.f32.mrb[10].mxu0  ;;  %v275_v61 = vpop.f32.mrb[10].mxu1 }
 0x108   :  { %v487_v62 = vpack.c.bf16 %v235_v60, %v231_v54  ;;  %v507_v63 = vpack.c.bf16 %v275_v61, %v271_v55  ;;  %v237_v0 = vpop.f32.mrb[11].mxu0  ;;  %v277_v1 = vpop.f32.mrb[11].mxu1 }
 0x109   :  { %397 = vst [vmem:[%s772_s4 + $0x20] sm:$0xff] %v381_v58  ;;  %405 = vst [vmem:[%s772_s4 + $0x60] sm:$0xff] %v389_v59  ;;  %v382_v2 = vadd.f32 %v679_v25, %v237_v0  ;;  %v390_v3 = vadd.f32 %v679_v25, %v277_v1 }
 0x10a   :  { %515 = vst [vmem:[%s773_s3 + $0x10] sm:$0xff] %v487_v62   ;;  %519 = vst [vmem:[%s773_s3 + $0x30] sm:$0xff] %v507_v63  }
 0x10b   :  { %398 = vst [vmem:[%s772_s4 + $0x28] sm:$0xff] %v382_v2  ;;  %406 = vst [vmem:[%s772_s4 + $0x68] sm:$0xff] %v390_v3 }
 0x10d   :  { %v241_v4 = vpop.f32.mrb[12].mxu0  ;;  %v281_v5 = vpop.f32.mrb[12].mxu1 }
 0x10e   :  { %v243_v6 = vpop.f32.mrb[13].mxu0  ;;  %v283_v7 = vpop.f32.mrb[13].mxu1 }
 0x10f   :  { %v383_v8 = vadd.f32 %v679_v25, %v243_v6  ;;  %v391_v9 = vadd.f32 %v679_v25, %v283_v7  ;;  %v245_v10 = vpop.f32.mrb[14].mxu0  ;;  %v285_v11 = vpop.f32.mrb[14].mxu1 }
 0x110   :  { %v492_v12 = vpack.c.bf16 %v245_v10, %v241_v4  ;;  %v512_v13 = vpack.c.bf16 %v285_v11, %v281_v5  ;;  %v247_v14 = vpop.f32.mrb[15].mxu0  ;;  %v287_v15 = vpop.f32.mrb[15].mxu1 }
 0x111   :  { %399 = vst [vmem:[%s772_s4 + $0x30] sm:$0xff] %v383_v8  ;;  %407 = vst [vmem:[%s772_s4 + $0x70] sm:$0xff] %v391_v9  ;;  %v384_v16 = vadd.f32 %v679_v25, %v247_v14  ;;  %v392_v17 = vadd.f32 %v679_v25, %v287_v15 }
 0x112   :  { %516 = vst [vmem:[%s773_s3 + $0x18] sm:$0xff] %v492_v12   ;;  %520 = vst [vmem:[%s773_s3 + $0x38] sm:$0xff] %v512_v13  }
 0x113   :  { %400 = vst [vmem:[%s772_s4 + $0x38] sm:$0xff] %v384_v16  ;;  %408 = vst [vmem:[%s772_s4 + $0x78] sm:$0xff] %v392_v17 }

// kernel: graph_conv_net_forward.5
= control target key start
LH: loop header
LB: loop body
LE: loop exit
PB: predicated region body
PF: predicated region fallthrough
CT: control target
= control target key end

     0   :  { %s774_s1 = inlined_call_operand.vmem [shape: bf16[128,128], index: 1, kind: input, shape index: {}]   ;;  %s775_s0 = inlined_call_operand.vmem [shape: bf16[128,128], index: 0, kind: input, shape index: {}]   ;;  %s776_s2 = inlined_call_operand.vmem [shape: f32[128,128], index: 2, kind: input, shape index: {}]   ;;  %s777_s3 = inlined_call_operand.vmem [shape: bf16[128,128], index: 3, kind: output, shape index: {}]  }
   0x1   :  { %v618_v0 = vld [vmem:[%s774_s1] sm:$0xff]   ;;  %v619_v1 = vld [vmem:[%s774_s1 + $0x8] sm:$0xff]   ;;  %v620_v2 = vld [vmem:[%s774_s1 + $0x10] sm:$0xff]  }
   0x2   :  { %570 = vmatprep.subr.bf16.mxu0 %v618_v0  ;;  %602 = vmatprep.subr.bf16.mxu1 %v618_v0  ;;  %v621_v3 = vld [vmem:[%s774_s1 + $0x18] sm:$0xff]   ;;  %v626_v4 = vld [vmem:[%s775_s0] sm:$0xff]   ;;  %v623_v7 = vld [vmem:[%s774_s1 + $0x28] sm:$0xff]  }
   0x3   :  { %571 = vmatpush3.bf16.msra.mxu0 %v618_v0  ;;  %610 = vmatpush3.bf16.msra.mxu1 %v618_v0  ;;  %v627_v5 = vld [vmem:[%s775_s0 + $0x20] sm:$0xff]   ;;  %v624_v8 = vld [vmem:[%s774_s1 + $0x30] sm:$0xff]   ;;  %v625_v9 = vld [vmem:[%s774_s1 + $0x38] sm:$0xff]  }
   0x4   :  { %572 = vmatprep.subr.bf16.mxu0 %v619_v1  ;;  %603 = vmatprep.subr.bf16.mxu1 %v619_v1  ;;  %v622_v6 = vld [vmem:[%s774_s1 + $0x20] sm:$0xff]   ;;  %v628_v10 = vld [vmem:[%s775_s0 + $0x8] sm:$0xff]   ;;  %v630_v12 = vld [vmem:[%s775_s0 + $0x10] sm:$0xff]  }
   0x5   :  { %586 = vmatprep.mubr.bf16.mxu0 %v626_v4  ;;  %594 = vmatprep.mubr.bf16.mxu1 %v627_v5  ;;  %v629_v11 = vld [vmem:[%s775_s0 + $0x28] sm:$0xff]   ;;  %v631_v13 = vld [vmem:[%s775_s0 + $0x30] sm:$0xff]   ;;  %v632_v14 = vld [vmem:[%s775_s0 + $0x18] sm:$0xff]  }
   0x6   :  { %v633_v15 = vld [vmem:[%s775_s0 + $0x38] sm:$0xff]   ;;  %v329_v16 = vld [vmem:[%s776_s2 + $0x10] sm:$0xff]  ;;  %v327_v18 = vld [vmem:[%s776_s2] sm:$0xff] }
   0x7   :  { %573 = vmatpush3.bf16.msra.mxu0 %v619_v1  ;;  %611 = vmatpush3.bf16.msra.mxu1 %v619_v1  ;;  %v337_v17 = vld [vmem:[%s776_s2 + $0x50] sm:$0xff]  ;;  %v335_v19 = vld [vmem:[%s776_s2 + $0x40] sm:$0xff]  ;;  %v330_v22 = vld [vmem:[%s776_s2 + $0x18] sm:$0xff] }
   0x8   :  { %574 = vmatprep.subr.bf16.mxu0 %v620_v2  ;;  %604 = vmatprep.subr.bf16.mxu1 %v620_v2  ;;  %v338_v23 = vld [vmem:[%s776_s2 + $0x58] sm:$0xff]  ;;  %v328_v28 = vld [vmem:[%s776_s2 + $0x8] sm:$0xff]  ;;  %v333_v48 = vld [vmem:[%s776_s2 + $0x30] sm:$0xff] }
   0x9   :  { %v336_v29 = vld [vmem:[%s776_s2 + $0x48] sm:$0xff]  ;;  %v341_v49 = vld [vmem:[%s776_s2 + $0x70] sm:$0xff]  ;;  %v331_v52 = vld [vmem:[%s776_s2 + $0x20] sm:$0xff] }
   0xa   :  { %v339_v53 = vld [vmem:[%s776_s2 + $0x60] sm:$0xff]  ;;  %v334_v58 = vld [vmem:[%s776_s2 + $0x38] sm:$0xff]  ;;  %v332_v0 = vld [vmem:[%s776_s2 + $0x28] sm:$0xff] }
   0xb   :  { %575 = vmatpush3.bf16.msra.mxu0 %v620_v2  ;;  %612 = vmatpush3.bf16.msra.mxu1 %v620_v2  ;;  %v342_v59 = vld [vmem:[%s776_s2 + $0x78] sm:$0xff]  ;;  %v340_v1 = vld [vmem:[%s776_s2 + $0x68] sm:$0xff] }
   0xc   :  { %576 = vmatprep.subr.bf16.mxu0 %v621_v3  ;;  %605 = vmatprep.subr.bf16.mxu1 %v621_v3 }
   0xf   :  { %577 = vmatpush3.bf16.msra.mxu0 %v621_v3  ;;  %613 = vmatpush3.bf16.msra.mxu1 %v621_v3 }
  0x10   :  { %578 = vmatprep.subr.bf16.mxu0 %v622_v6  ;;  %606 = vmatprep.subr.bf16.mxu1 %v622_v6 }
  0x13   :  { %579 = vmatpush3.bf16.msra.mxu0 %v622_v6  ;;  %614 = vmatpush3.bf16.msra.mxu1 %v622_v6 }
  0x14   :  { %580 = vmatprep.subr.bf16.mxu0 %v623_v7  ;;  %607 = vmatprep.subr.bf16.mxu1 %v623_v7 }
  0x17   :  { %581 = vmatpush3.bf16.msra.mxu0 %v623_v7  ;;  %615 = vmatpush3.bf16.msra.mxu1 %v623_v7 }
  0x18   :  { %582 = vmatprep.subr.bf16.mxu0 %v624_v8  ;;  %608 = vmatprep.subr.bf16.mxu1 %v624_v8 }
  0x1b   :  { %583 = vmatpush3.bf16.msra.mxu0 %v624_v8  ;;  %616 = vmatpush3.bf16.msra.mxu1 %v624_v8 }
  0x1c   :  { %584 = vmatprep.subr.bf16.mxu0 %v625_v9  ;;  %609 = vmatprep.subr.bf16.mxu1 %v625_v9 }
  0x1f   :  { %585 = vmatpush3.bf16.msra.mxu0 %v625_v9  ;;  %617 = vmatpush3.bf16.msra.mxu1 %v625_v9 }
  0x22   :  { %587 = vmatmul.mubr.bf16.vlgmr.msra.gmra.mrb[0].mxu0 %v628_v10  ;;  %595 = vmatmul.mubr.bf16.vlgmr.msra.gmra.mrb[0].mxu1 %v629_v11 }
  0x23   :  { %590 = vmatprep.mubr.bf16.mxu0 %v630_v12  ;;  %598 = vmatprep.mubr.bf16.mxu1 %v631_v13 }
  0x2a   :  { %591 = vmatmul.mubr.bf16.gmra.mrb[4].mxu0 %v632_v14  ;;  %599 = vmatmul.mubr.bf16.gmra.mrb[4].mxu1 %v633_v15 }
  0xf5   :  { %v588_v20 = vpop.f32.mrb[0].mxu0  ;;  %v596_v21 = vpop.f32.mrb[0].mxu1 }
  0xf6   :  { %v345_v24 = vadd.f32 %v588_v20, %v329_v16  ;;  %v353_v25 = vadd.f32 %v596_v21, %v337_v17  ;;  %v213_v26 = vpop.f32.mrb[1].mxu0  ;;  %v245_v27 = vpop.f32.mrb[1].mxu1 }
  0xf7   :  { %v343_v30 = vadd.f32 %v327_v18, %v213_v26  ;;  %v351_v31 = vadd.f32 %v335_v19, %v245_v27  ;;  %v589_v32 = vpop.f32.mrb[2].mxu0  ;;  %v597_v33 = vpop.f32.mrb[2].mxu1 }
  0xf8   :  { %v346_v34 = vadd.f32 %v589_v32, %v330_v22  ;;  %v354_v35 = vadd.f32 %v597_v33, %v338_v23  ;;  %v216_v36 = vpop.f32.mrb[3].mxu0  ;;  %v248_v37 = vpop.f32.mrb[3].mxu1  ;;  %v361_v40 = vmax.f32 %v345_v24, 0.0  ;;  %v369_v41 = vmax.f32 %v353_v25, 0.0 }
  0xf9   :  { %v344_v38 = vadd.f32 %v328_v28, %v216_v36  ;;  %v352_v39 = vadd.f32 %v336_v29, %v248_v37  ;;  %v359_v44 = vmax.f32 %v343_v30, 0.0  ;;  %v367_v45 = vmax.f32 %v351_v31, 0.0 }
  0xfa   :  { %v362_v42 = vmax.f32 %v346_v34, 0.0  ;;  %v370_v43 = vmax.f32 %v354_v35, 0.0 }
  0xfb   :  { %v360_v46 = vmax.f32 %v344_v38, 0.0  ;;  %v368_v47 = vmax.f32 %v352_v39, 0.0 }
  0xfc   :  { %v515_v50 = vpack.c.bf16 %v362_v42, %v361_v40  ;;  %v535_v51 = vpack.c.bf16 %v370_v43, %v369_v41 }
  0xfd   :  { %v510_v54 = vpack.c.bf16 %v360_v46, %v359_v44  ;;  %v530_v55 = vpack.c.bf16 %v368_v47, %v367_v45  ;;  %v592_v56 = vpop.f32.mrb[4].mxu0  ;;  %v600_v57 = vpop.f32.mrb[4].mxu1 }
  0xfe   :  { %547 = vst [vmem:[%s777_s3 + $0x8] sm:$0xff] %v515_v50   ;;  %551 = vst [vmem:[%s777_s3 + $0x28] sm:$0xff] %v535_v51   ;;  %v349_v60 = vadd.f32 %v592_v56, %v333_v48  ;;  %v357_v61 = vadd.f32 %v600_v57, %v341_v49  ;;  %v229_v62 = vpop.f32.mrb[5].mxu0  ;;  %v261_v63 = vpop.f32.mrb[5].mxu1 }
  0xff   :  { %511 = vst [vmem:[%s777_s3] sm:$0xff] %v510_v54   ;;  %550 = vst [vmem:[%s777_s3 + $0x20] sm:$0xff] %v530_v55   ;;  %v347_v2 = vadd.f32 %v331_v52, %v229_v62  ;;  %v355_v3 = vadd.f32 %v339_v53, %v261_v63  ;;  %v593_v4 = vpop.f32.mrb[6].mxu0  ;;  %v601_v5 = vpop.f32.mrb[6].mxu1 }
 0x100   :  { %v350_v6 = vadd.f32 %v593_v4, %v334_v58  ;;  %v358_v7 = vadd.f32 %v601_v5, %v342_v59  ;;  %v232_v8 = vpop.f32.mrb[7].mxu0  ;;  %v264_v9 = vpop.f32.mrb[7].mxu1  ;;  %v365_v12 = vmax.f32 %v349_v60, 0.0  ;;  %v373_v13 = vmax.f32 %v357_v61, 0.0 }
 0x101   :  { %v348_v10 = vadd.f32 %v332_v0, %v232_v8  ;;  %v356_v11 = vadd.f32 %v340_v1, %v264_v9  ;;  %v363_v16 = vmax.f32 %v347_v2, 0.0  ;;  %v371_v17 = vmax.f32 %v355_v3, 0.0 }
 0x102   :  { %v366_v14 = vmax.f32 %v350_v6, 0.0  ;;  %v374_v15 = vmax.f32 %v358_v7, 0.0 }
 0x103   :  { %v364_v18 = vmax.f32 %v348_v10, 0.0  ;;  %v372_v19 = vmax.f32 %v356_v11, 0.0 }
 0x104   :  { %v525_v20 = vpack.c.bf16 %v366_v14, %v365_v12  ;;  %v545_v21 = vpack.c.bf16 %v374_v15, %v373_v13 }
 0x105   :  { %v520_v22 = vpack.c.bf16 %v364_v18, %v363_v16  ;;  %v540_v23 = vpack.c.bf16 %v372_v19, %v371_v17 }
 0x106   :  { %549 = vst [vmem:[%s777_s3 + $0x18] sm:$0xff] %v525_v20   ;;  %553 = vst [vmem:[%s777_s3 + $0x38] sm:$0xff] %v545_v21  }
 0x107   :  { %548 = vst [vmem:[%s777_s3 + $0x10] sm:$0xff] %v520_v22   ;;  %552 = vst [vmem:[%s777_s3 + $0x30] sm:$0xff] %v540_v23  }

// kernel: graph_conv_net_forward.7
= control target key start
LH: loop header
LB: loop body
LE: loop exit
PB: predicated region body
PF: predicated region fallthrough
CT: control target
= control target key end

     0   :  { %s1231_s1 = inlined_call_operand.vmem [shape: bf16[128,128], index: 1, kind: input, shape index: {}]   ;;  %s1232_s0 = inlined_call_operand.vmem [shape: bf16[128,128], index: 0, kind: input, shape index: {}]   ;;  %s1233_s3 = inlined_call_operand.vmem [shape: bf16[128,128], index: 3, kind: input, shape index: {}]   ;;  %s1234_s2 = inlined_call_operand.vmem [shape: f32[128,128], index: 2, kind: input, shape index: {}]   ;;  %s1235_s4 = inlined_call_operand.vmem [shape: f32[1,128], index: 4, kind: input, shape index: {}]   ;;  %s1236_s5 = inlined_call_operand.vmem [shape: f32[128,128], index: 5, kind: output, shape index: {}]  }
   0x1   :  { %v858_v0 = vld [vmem:[%s1231_s1] sm:$0xff]   ;;  %v859_v1 = vld [vmem:[%s1231_s1 + $0x8] sm:$0xff]   ;;  %v860_v2 = vld [vmem:[%s1231_s1 + $0x10] sm:$0xff]  }
   0x2   :  { %794 = vmatprep.subr.bf16.mxu0 %v858_v0  ;;  %v861_v3 = vld [vmem:[%s1231_s1 + $0x18] sm:$0xff]   ;;  %v866_v4 = vld [vmem:[%s1232_s0] sm:$0xff]   ;;  %v863_v6 = vld [vmem:[%s1231_s1 + $0x28] sm:$0xff]  }
   0x3   :  { %795 = vmatpush3.bf16.msra.mxu0 %v858_v0  ;;  %810 = vmatprep.mubr.bf16.mxu0 %v866_v4  ;;  %v862_v5 = vld [vmem:[%s1231_s1 + $0x20] sm:$0xff]   ;;  %v875_v8 = vld [vmem:[%s1233_s3 + $0x8] sm:$0xff]   ;;  %v864_v9 = vld [vmem:[%s1231_s1 + $0x30] sm:$0xff]  }
   0x4   :  { %796 = vmatprep.subr.bf16.mxu0 %v859_v1  ;;  %v874_v7 = vld [vmem:[%s1233_s3] sm:$0xff]   ;;  %v876_v10 = vld [vmem:[%s1233_s3 + $0x10] sm:$0xff]   ;;  %v865_v11 = vld [vmem:[%s1231_s1 + $0x38] sm:$0xff]  }
   0x5   :  { %826 = vmatprep.subr.bf16.mxu1 %v874_v7  ;;  %v877_v12 = vld [vmem:[%s1233_s3 + $0x18] sm:$0xff]   ;;  %v878_v13 = vld [vmem:[%s1233_s3 + $0x20] sm:$0xff]   ;;  %v867_v14 = vld [vmem:[%s1232_s0 + $0x8] sm:$0xff]  }
   0x6   :  { %827 = vmatpush3.bf16.msra.mxu1 %v874_v7  ;;  %v868_v15 = vld [vmem:[%s1232_s0 + $0x10] sm:$0xff]   ;;  %v879_v16 = vld [vmem:[%s1233_s3 + $0x28] sm:$0xff]   ;;  %v869_v17 = vld [vmem:[%s1232_s0 + $0x18] sm:$0xff]  }
   0x7   :  { %797 = vmatpush3.bf16.msra.mxu0 %v859_v1  ;;  %828 = vmatprep.subr.bf16.mxu1 %v875_v8  ;;  %v870_v18 = vld [vmem:[%s1232_s0 + $0x20] sm:$0xff]   ;;  %v871_v19 = vld [vmem:[%s1232_s0 + $0x28] sm:$0xff]   ;;  %v872_v20 = vld [vmem:[%s1232_s0 + $0x30] sm:$0xff]  }
   0x8   :  { %798 = vmatprep.subr.bf16.mxu0 %v860_v2  ;;  %v873_v21 = vld [vmem:[%s1232_s0 + $0x38] sm:$0xff]   ;;  %v880_v22 = vld [vmem:[%s1233_s3 + $0x30] sm:$0xff]   ;;  %v333_v25 = vld [vmem:[%s1234_s2] sm:$0xff] }
   0x9   :  { %v881_v23 = vld [vmem:[%s1233_s3 + $0x38] sm:$0xff]   ;;  %v335_v24 = vld [vmem:[%s1234_s2 + $0x10] sm:$0xff]  ;;  %v334_v30 = vld [vmem:[%s1234_s2 + $0x8] sm:$0xff] }
   0xa   :  { %829 = vmatpush3.bf16.msra.mxu1 %v875_v8  ;;  %v336_v27 = vld [vmem:[%s1234_s2 + $0x18] sm:$0xff]  ;;  %v339_v40 = vld [vmem:[%s1234_s2 + $0x30] sm:$0xff]  ;;  %v337_v42 = vld [vmem:[%s1234_s2 + $0x20] sm:$0xff] }
   0xb   :  { %799 = vmatpush3.bf16.msra.mxu0 %v860_v2  ;;  %830 = vmatprep.subr.bf16.mxu1 %v876_v10  ;;  %v340_v44 = vld [vmem:[%s1234_s2 + $0x38] sm:$0xff]  ;;  %v338_v48 = vld [vmem:[%s1234_s2 + $0x28] sm:$0xff]  ;;  %v343_v58 = vld [vmem:[%s1234_s2 + $0x50] sm:$0xff] }
   0xc   :  { %800 = vmatprep.subr.bf16.mxu0 %v861_v3  ;;  %v341_v60 = vld [vmem:[%s1234_s2 + $0x40] sm:$0xff]  ;;  %v344_v63 = vld [vmem:[%s1234_s2 + $0x58] sm:$0xff]  ;;  %v342_v2 = vld [vmem:[%s1234_s2 + $0x48] sm:$0xff] }
   0xe   :  { %831 = vmatpush3.bf16.msra.mxu1 %v876_v10 }
   0xf   :  { %801 = vmatpush3.bf16.msra.mxu0 %v861_v3  ;;  %832 = vmatprep.subr.bf16.mxu1 %v877_v12 }
  0x10   :  { %802 = vmatprep.subr.bf16.mxu0 %v862_v5 }
  0x12   :  { %833 = vmatpush3.bf16.msra.mxu1 %v877_v12  ;;  %v347_v12 = vld [vmem:[%s1234_s2 + $0x70] sm:$0xff] }
  0x13   :  { %803 = vmatpush3.bf16.msra.mxu0 %v862_v5  ;;  %834 = vmatprep.subr.bf16.mxu1 %v878_v13 }
  0x14   :  { %804 = vmatprep.subr.bf16.mxu0 %v863_v6 }
  0x16   :  { %835 = vmatpush3.bf16.msra.mxu1 %v878_v13 }
  0x17   :  { %805 = vmatpush3.bf16.msra.mxu0 %v863_v6  ;;  %836 = vmatprep.subr.bf16.mxu1 %v879_v16 }
  0x18   :  { %806 = vmatprep.subr.bf16.mxu0 %v864_v9 }
  0x1a   :  { %837 = vmatpush3.bf16.msra.mxu1 %v879_v16 }
  0x1b   :  { %807 = vmatpush3.bf16.msra.mxu0 %v864_v9  ;;  %838 = vmatprep.subr.bf16.mxu1 %v880_v22 }
  0x1c   :  { %808 = vmatprep.subr.bf16.mxu0 %v865_v11 }
  0x1e   :  { %839 = vmatpush3.bf16.msra.mxu1 %v880_v22 }
  0x1f   :  { %809 = vmatpush3.bf16.msra.mxu0 %v865_v11  ;;  %840 = vmatprep.subr.bf16.mxu1 %v881_v23 }
  0x22   :  { %811 = vmatmul.mubr.bf16.vlgmr.msra.gmra.mrb[0].mxu0 %v867_v14  ;;  %841 = vmatpush3.bf16.msra.mxu1 %v881_v23  ;;  %v345_v14 = vld [vmem:[%s1234_s2 + $0x60] sm:$0xff] }
  0x23   :  { %814 = vmatprep.mubr.bf16.mxu0 %v868_v15 }
  0x2a   :  { %815 = vmatmul.mubr.bf16.gmra.mrb[4].mxu0 %v869_v17  ;;  %v348_v17 = vld [vmem:[%s1234_s2 + $0x78] sm:$0xff] }
  0x2b   :  { %818 = vmatprep.mubr.bf16.mxu0 %v870_v18 }
  0x32   :  { %819 = vmatmul.mubr.bf16.gmra.mrb[8].mxu0 %v871_v19 }
  0x33   :  { %822 = vmatprep.mubr.bf16.mxu0 %v872_v20  ;;  %v346_v20 = vld [vmem:[%s1234_s2 + $0x68] sm:$0xff] }
  0x3a   :  { %823 = vmatmul.mubr.bf16.gmra.mrb[12].mxu0 %v873_v21 }
  0xf5   :  { %v812_v26 = vpop.f32.mrb[0].mxu0 }
  0xf6   :  { %v351_v28 = vadd.f32 %v812_v26, %v335_v24  ;;  %v219_v29 = vpop.f32.mrb[1].mxu0 }
  0xf7   :  { %v349_v31 = vadd.f32 %v333_v25, %v219_v29  ;;  %v813_v32 = vpop.f32.mrb[2].mxu0 }
  0xf8   :  { %v352_v33 = vadd.f32 %v813_v32, %v336_v27  ;;  %v222_v34 = vpop.f32.mrb[3].mxu0  ;;  %v367_v36 = vmax.f32 %v351_v28, 0.0  ;;  %v753_v32 = vld [vmem:[%s1235_s4] ss:$0 sm:$0xff] }
  0xf9   :  { %v350_v35 = vadd.f32 %v334_v30, %v222_v34  ;;  %v365_v38 = vmax.f32 %v349_v31, 0.0 }
  0xfa   :  { %v368_v37 = vmax.f32 %v352_v33, 0.0 }
  0xfb   :  { %v366_v39 = vmax.f32 %v350_v35, 0.0 }
  0xfc   :  { %v382_v41 = vpack.c.bf16 %v368_v37, %v367_v36 }
  0xfd   :  { %v816_v43 = vpop.f32.mrb[4].mxu0  ;;  %v381_v45 = vpack.c.bf16 %v366_v39, %v365_v38 }
  0xfe   :  { %v355_v46 = vadd.f32 %v816_v43, %v339_v40  ;;  %v235_v47 = vpop.f32.mrb[5].mxu0 }
  0xff   :  { %v353_v49 = vadd.f32 %v337_v42, %v235_v47  ;;  %v817_v50 = vpop.f32.mrb[6].mxu0  ;;  %842 = vmatprep.mubr.bf16.mxu1 %v381_v45 }
 0x100   :  { %v371_v51 = vmax.f32 %v355_v46, 0.0  ;;  %v356_v52 = vadd.f32 %v817_v50, %v340_v44  ;;  %v238_v53 = vpop.f32.mrb[7].mxu0  ;;  %843 = vmatmul.mubr.bf16.vlgmr.msra.gmra.mrb[0].mxu1 %v382_v41 }
 0x101   :  { %v354_v54 = vadd.f32 %v338_v48, %v238_v53  ;;  %v369_v56 = vmax.f32 %v353_v49, 0.0 }
 0x102   :  { %v372_v55 = vmax.f32 %v356_v52, 0.0 }
 0x103   :  { %v370_v57 = vmax.f32 %v354_v54, 0.0 }
 0x104   :  { %v384_v59 = vpack.c.bf16 %v372_v55, %v371_v51 }
 0x105   :  { %v383_v61 = vpack.c.bf16 %v370_v57, %v369_v56  ;;  %v820_v62 = vpop.f32.mrb[8].mxu0 }
 0x106   :  { %v359_v0 = vadd.f32 %v820_v62, %v343_v58  ;;  %v251_v1 = vpop.f32.mrb[9].mxu0 }
 0x107   :  { %v357_v3 = vadd.f32 %v341_v60, %v251_v1  ;;  %v821_v4 = vpop.f32.mrb[10].mxu0  ;;  %846 = vmatprep.mubr.bf16.mxu1 %v383_v61 }
 0x108   :  { %v375_v5 = vmax.f32 %v359_v0, 0.0  ;;  %v360_v6 = vadd.f32 %v821_v4, %v344_v63  ;;  %v254_v7 = vpop.f32.mrb[11].mxu0  ;;  %847 = vmatmul.mubr.bf16.gmra.mrb[4].mxu1 %v384_v59 }
 0x109   :  { %v358_v8 = vadd.f32 %v342_v2, %v254_v7  ;;  %v373_v10 = vmax.f32 %v357_v3, 0.0 }
 0x10a   :  { %v376_v9 = vmax.f32 %v360_v6, 0.0 }
 0x10b   :  { %v374_v11 = vmax.f32 %v358_v8, 0.0 }
 0x10c   :  { %v386_v13 = vpack.c.bf16 %v376_v9, %v375_v5 }
 0x10d   :  { %v385_v15 = vpack.c.bf16 %v374_v11, %v373_v10  ;;  %v824_v16 = vpop.f32.mrb[12].mxu0 }
 0x10e   :  { %v363_v18 = vadd.f32 %v824_v16, %v347_v12  ;;  %v267_v19 = vpop.f32.mrb[13].mxu0 }
 0x10f   :  { %v361_v21 = vadd.f32 %v345_v14, %v267_v19  ;;  %v825_v22 = vpop.f32.mrb[14].mxu0  ;;  %850 = vmatprep.mubr.bf16.mxu1 %v385_v15 }
 0x110   :  { %v379_v23 = vmax.f32 %v363_v18, 0.0  ;;  %v364_v24 = vadd.f32 %v825_v22, %v348_v17  ;;  %v270_v25 = vpop.f32.mrb[15].mxu0  ;;  %851 = vmatmul.mubr.bf16.gmra.mrb[8].mxu1 %v386_v13 }
 0x111   :  { %v362_v26 = vadd.f32 %v346_v20, %v270_v25  ;;  %v377_v28 = vmax.f32 %v361_v21, 0.0 }
 0x112   :  { %v380_v27 = vmax.f32 %v364_v24, 0.0 }
 0x113   :  { %v378_v29 = vmax.f32 %v362_v26, 0.0 }
 0x114   :  { %v388_v30 = vpack.c.bf16 %v380_v27, %v379_v23 }
 0x115   :  { %v387_v31 = vpack.c.bf16 %v378_v29, %v377_v28 }
 0x117   :  { %854 = vmatprep.mubr.bf16.mxu1 %v387_v31 }
 0x118   :  { %855 = vmatmul.mubr.bf16.gmra.mrb[12].mxu1 %v388_v30 }
 0x1d3   :  { %v844_v33 = vpop.f32.mrb[0].mxu1 }
 0x1d4   :  { %v503_v34 = vadd.f32 %v844_v33, %v753_v32  ;;  %v494_v35 = vpop.f32.mrb[1].mxu1 }
 0x1d5   :  { %v495_v36 = vadd.f32 %v753_v32, %v494_v35  ;;  %v845_v37 = vpop.f32.mrb[2].mxu1 }
 0x1d6   :  { %561 = vmax.xlane.f32.xlu1 %v503_v34  ;;  %v497_v38 = vpop.f32.mrb[3].mxu1  ;;  %v506_v39 = vadd.f32 %v845_v37, %v753_v32 }
 0x1d7   :  { %557 = vmax.xlane.f32.xlu0 %v495_v36  ;;  %v498_v40 = vadd.f32 %v753_v32, %v497_v38 }
 0x1da   :  { %563 = vmax.xlane.f32.xlu1 %v506_v39 }
 0x1db   :  { %559 = vmax.xlane.f32.xlu0 %v498_v40  ;;  %v848_v41 = vpop.f32.mrb[4].mxu1 }
 0x1dc   :  { %v519_v42 = vadd.f32 %v848_v41, %v753_v32  ;;  %v510_v43 = vpop.f32.mrb[5].mxu1 }
 0x1dd   :  { %v849_v44 = vpop.f32.mrb[6].mxu1  ;;  %v511_v47 = vadd.f32 %v753_v32, %v510_v43 }
 0x1de   :  { %v522_v45 = vadd.f32 %v849_v44, %v753_v32  ;;  %v513_v46 = vpop.f32.mrb[7].mxu1 }
 0x1df   :  { %569 = vmax.xlane.f32.xlu0 %v519_v42  ;;  %v514_v48 = vadd.f32 %v753_v32, %v513_v46 }
 0x1e0   :  { %571 = vmax.xlane.f32.xlu1 %v522_v45 }
 0x1e3   :  { %565 = vmax.xlane.f32.xlu0 %v511_v47  ;;  %v852_v49 = vpop.f32.mrb[8].mxu1 }
 0x1e4   :  { %v535_v50 = vadd.f32 %v852_v49, %v753_v32  ;;  %567 = vmax.xlane.f32.xlu1 %v514_v48  ;;  %v526_v51 = vpop.f32.mrb[9].mxu1 }
 0x1e5   :  { %v853_v52 = vpop.f32.mrb[10].mxu1  ;;  %v527_v55 = vadd.f32 %v753_v32, %v526_v51 }
 0x1e6   :  { %v538_v53 = vadd.f32 %v853_v52, %v753_v32  ;;  %v529_v54 = vpop.f32.mrb[11].mxu1 }
 0x1e7   :  { %577 = vmax.xlane.f32.xlu0 %v535_v50  ;;  %v1099_v56 = vadd.f32 %v753_v32, %v529_v54 }
 0x1e8   :  { %579 = vmax.xlane.f32.xlu1 %v538_v53 }
 0x1eb   :  { %573 = vmax.xlane.f32.xlu0 %v527_v55  ;;  %v856_v57 = vpop.f32.mrb[12].mxu1 }
 0x1ec   :  { %575 = vmax.xlane.f32.xlu1 %v1099_v56  ;;  %v542_v58 = vpop.f32.mrb[13].mxu1  ;;  %v1107_v63 = vadd.f32 %v856_v57, %v753_v32 }
 0x1ed   :  { %v1102_v59 = vadd.f32 %v753_v32, %v542_v58  ;;  %v857_v60 = vpop.f32.mrb[14].mxu1 }
 0x1ee   :  { %v545_v61 = vpop.f32.mrb[15].mxu1  ;;  %v1110_v0 = vadd.f32 %v857_v60, %v753_v32 }
 0x1ef   :  { %v1104_v62 = vadd.f32 %v753_v32, %v545_v61  ;;  %581 = vmax.xlane.f32.xlu0 %v1102_v59 }
 0x1f1   :  { %583 = vmax.xlane.f32.xlu1 %v1104_v62 }
 0x1f3   :  { %585 = vmax.xlane.f32.xlu0 %v1107_v63 }
 0x1f5   :  { %587 = vmax.xlane.f32.xlu1 %v1110_v0 }
 0x263   :  { %v562_v1 = vpop.xlane.xlu1 %561 }
 0x264   :  { %v1114_v2 = vsub.f32 %v503_v34, %v562_v1  ;;  %v558_v3 = vpop.xlane.xlu0 %557 }
 0x265   :  { %v1116_v4 = vsub.f32 %v495_v36, %v558_v3 }
 0x266   :  { %v609_v5 = vmul.f32 1.442695, %v1114_v2 }
 0x267   :  { %v605_v6 = vmul.f32 1.442695, %v1116_v4  ;;  %v564_v7 = vpop.xlane.xlu1 %563 }
 0x268   :  { %882 = vpow2.f32 %v609_v5  ;;  %v1120_v8 = vsub.f32 %v506_v39, %v564_v7  ;;  %v560_v9 = vpop.xlane.xlu0 %559 }
 0x269   :  { %v1122_v10 = vsub.f32 %v498_v40, %v560_v9  ;;  %884 = vpow2.f32 %v605_v6 }
 0x26a   :  { %v611_v11 = vmul.f32 1.442695, %v1120_v8 }
 0x26b   :  { %v607_v12 = vmul.f32 1.442695, %v1122_v10 }
 0x26c   :  { %886 = vpow2.f32 %v611_v11  ;;  %v570_v13 = vpop.xlane.xlu0 %569 }
 0x26d   :  { %v1126_v14 = vsub.f32 %v519_v42, %v570_v13  ;;  %v572_v15 = vpop.xlane.xlu1 %571  ;;  %888 = vpow2.f32 %v607_v12 }
 0x26e   :  { %v1128_v16 = vsub.f32 %v522_v45, %v572_v15 }
 0x26f   :  { %v617_v17 = vmul.f32 1.442695, %v1126_v14 }
 0x270   :  { %v619_v18 = vmul.f32 1.442695, %v1128_v16  ;;  %v566_v19 = vpop.xlane.xlu0 %565 }
 0x271   :  { %890 = vpow2.f32 %v617_v17  ;;  %v1132_v20 = vsub.f32 %v511_v47, %v566_v19  ;;  %v568_v21 = vpop.xlane.xlu1 %567 }
 0x272   :  { %v883_v22 = vpop.eup %882  ;;  %v1134_v23 = vsub.f32 %v514_v48, %v568_v21  ;;  %892 = vpow2.f32 %v619_v18 }
 0x273   :  { %v613_v24 = vmul.f32 1.442695, %v1132_v20  ;;  %641 = vadd.xlane.f32.xlu0 %v883_v22  ;;  %v885_v27 = vpop.eup %884 }
 0x274   :  { %v615_v25 = vmul.f32 1.442695, %v1134_v23  ;;  %v578_v26 = vpop.xlane.xlu0 %577 }
 0x275   :  { %894 = vpow2.f32 %v613_v24  ;;  %v1138_v28 = vsub.f32 %v535_v50, %v578_v26  ;;  %v580_v29 = vpop.xlane.xlu1 %579 }
 0x276   :  { %v887_v30 = vpop.eup %886  ;;  %v1140_v31 = vsub.f32 %v538_v53, %v580_v29  ;;  %896 = vpow2.f32 %v615_v25 }
 0x277   :  { %v625_v32 = vmul.f32 1.442695, %v1138_v28  ;;  %643 = vadd.xlane.f32.xlu1 %v887_v30  ;;  %637 = vadd.xlane.f32.xlu0 %v885_v27  ;;  %v889_v37 = vpop.eup %888 }
 0x278   :  { %v627_v33 = vmul.f32 1.442695, %v1140_v31  ;;  %v574_v34 = vpop.xlane.xlu0 %573 }
 0x279   :  { %898 = vpow2.f32 %v625_v32  ;;  %v1144_v35 = vsub.f32 %v527_v55, %v574_v34  ;;  %v576_v36 = vpop.xlane.xlu1 %575 }
 0x27a   :  { %v1147_v38 = vsub.f32 %v1099_v56, %v576_v36  ;;  %900 = vpow2.f32 %v627_v33 }
 0x27b   :  { %v891_v39 = vpop.eup %890  ;;  %v621_v40 = vmul.f32 1.442695, %v1144_v35  ;;  %639 = vadd.xlane.f32.xlu1 %v889_v37 }
 0x27c   :  { %v623_v41 = vmul.f32 1.442695, %v1147_v38  ;;  %649 = vadd.xlane.f32.xlu0 %v891_v39  ;;  %v582_v42 = vpop.xlane.xlu0 %581  ;;  %v893_v44 = vpop.eup %892 }
 0x27d   :  { %902 = vpow2.f32 %v621_v40  ;;  %v1152_v43 = vsub.f32 %v1102_v59, %v582_v42 }
 0x27e   :  { %v584_v45 = vpop.xlane.xlu1 %583  ;;  %904 = vpow2.f32 %v623_v41 }
 0x27f   :  { %v895_v46 = vpop.eup %894  ;;  %v629_v47 = vmul.f32 1.442695, %v1152_v43  ;;  %v1156_v48 = vsub.f32 %v1104_v62, %v584_v45  ;;  %651 = vadd.xlane.f32.xlu1 %v893_v44 }
 0x280   :  { %645 = vadd.xlane.f32.xlu0 %v895_v46  ;;  %v586_v49 = vpop.xlane.xlu0 %585  ;;  %v897_v52 = vpop.eup %896 }
 0x281   :  { %906 = vpow2.f32 %v629_v47  ;;  %v631_v50 = vmul.f32 1.442695, %v1156_v48  ;;  %v1160_v51 = vsub.f32 %v1107_v63, %v586_v49 }
 0x282   :  { %v588_v53 = vpop.xlane.xlu1 %587 }
 0x283   :  { %v899_v54 = vpop.eup %898  ;;  %908 = vpow2.f32 %v631_v50  ;;  %v633_v55 = vmul.f32 1.442695, %v1160_v51  ;;  %v1164_v56 = vsub.f32 %v1110_v0, %v588_v53  ;;  %647 = vadd.xlane.f32.xlu1 %v897_v52 }
 0x284   :  { %657 = vadd.xlane.f32.xlu0 %v899_v54  ;;  %v901_v58 = vpop.eup %900 }
 0x285   :  { %910 = vpow2.f32 %v633_v55  ;;  %v635_v57 = vmul.f32 1.442695, %v1164_v56 }
 0x287   :  { %v903_v59 = vpop.eup %902  ;;  %912 = vpow2.f32 %v635_v57  ;;  %659 = vadd.xlane.f32.xlu1 %v901_v58 }
 0x288   :  { %653 = vadd.xlane.f32.xlu0 %v903_v59  ;;  %v905_v60 = vpop.eup %904 }
 0x28b   :  { %v907_v61 = vpop.eup %906  ;;  %655 = vadd.xlane.f32.xlu1 %v905_v60 }
 0x28c   :  { %661 = vadd.xlane.f32.xlu0 %v907_v61 }
 0x28d   :  { %v909_v62 = vpop.eup %908 }
 0x28f   :  { %v911_v63 = vpop.eup %910  ;;  %663 = vadd.xlane.f32.xlu1 %v909_v62 }
 0x290   :  { %665 = vadd.xlane.f32.xlu0 %v911_v63 }
 0x291   :  { %v913_v0 = vpop.eup %912 }
 0x293   :  { %667 = vadd.xlane.f32.xlu1 %v913_v0 }
 0x300   :  { %v642_v1 = vpop.xlane.xlu0 %641 }
 0x301   :  { %914 = vlog2.f32 %v642_v1 }
 0x304   :  { %v644_v3 = vpop.xlane.xlu1 %643  ;;  %v638_v5 = vpop.xlane.xlu0 %637 }
 0x305   :  { %916 = vlog2.f32 %v644_v3 }
 0x306   :  { %918 = vlog2.f32 %v638_v5 }
 0x308   :  { %v640_v6 = vpop.xlane.xlu1 %639 }
 0x309   :  { %920 = vlog2.f32 %v640_v6  ;;  %v650_v7 = vpop.xlane.xlu0 %649 }
 0x30a   :  { %922 = vlog2.f32 %v650_v7 }
 0x30b   :  { %v915_v9 = vpop.eup %914 }
 0x30c   :  { %v674_v11 = vmul.f32 0.6931472, %v915_v9  ;;  %v652_v12 = vpop.xlane.xlu1 %651 }
 0x30d   :  { %924 = vlog2.f32 %v652_v12  ;;  %v646_v13 = vpop.xlane.xlu0 %645 }
 0x30e   :  { %v703_v15 = vsub.f32 %v1114_v2, %v674_v11  ;;  %926 = vlog2.f32 %v646_v13 }
 0x30f   :  { %v917_v17 = vpop.eup %916 }
 0x310   :  { %v919_v18 = vpop.eup %918  ;;  %719 = vst [vmem:[%s1236_s5 + $0x10] sm:$0xff] %v703_v15  ;;  %v676_v19 = vmul.f32 0.6931472, %v917_v17  ;;  %v648_v21 = vpop.xlane.xlu1 %647 }
 0x311   :  { %v670_v22 = vmul.f32 0.6931472, %v919_v18  ;;  %928 = vlog2.f32 %v648_v21  ;;  %v658_v24 = vpop.xlane.xlu0 %657 }
 0x312   :  { %v704_v25 = vsub.f32 %v1120_v8, %v676_v19  ;;  %930 = vlog2.f32 %v658_v24 }
 0x313   :  { %v921_v26 = vpop.eup %920  ;;  %v701_v27 = vsub.f32 %v1116_v4, %v670_v22 }
 0x314   :  { %v923_v29 = vpop.eup %922  ;;  %720 = vst [vmem:[%s1236_s5 + $0x18] sm:$0xff] %v704_v25  ;;  %v672_v2 = vmul.f32 0.6931472, %v921_v26  ;;  %v660_v30 = vpop.xlane.xlu1 %659 }
 0x315   :  { %717 = vst [vmem:[%s1236_s5] sm:$0xff] %v701_v27  ;;  %v682_v32 = vmul.f32 0.6931472, %v923_v29  ;;  %932 = vlog2.f32 %v660_v30  ;;  %v654_v33 = vpop.xlane.xlu0 %653 }
 0x316   :  { %v702_v8 = vsub.f32 %v1122_v10, %v672_v2  ;;  %934 = vlog2.f32 %v654_v33 }
 0x317   :  { %v925_v34 = vpop.eup %924  ;;  %v707_v4 = vsub.f32 %v1126_v14, %v682_v32 }
 0x318   :  { %v927_v36 = vpop.eup %926  ;;  %718 = vst [vmem:[%s1236_s5 + $0x8] sm:$0xff] %v702_v8  ;;  %v684_v37 = vmul.f32 0.6931472, %v925_v34  ;;  %v656_v39 = vpop.xlane.xlu1 %655 }
 0x319   :  { %723 = vst [vmem:[%s1236_s5 + $0x30] sm:$0xff] %v707_v4  ;;  %v678_v40 = vmul.f32 0.6931472, %v927_v36  ;;  %936 = vlog2.f32 %v656_v39  ;;  %v662_v41 = vpop.xlane.xlu0 %661 }
 0x31a   :  { %v708_v10 = vsub.f32 %v1128_v16, %v684_v37  ;;  %938 = vlog2.f32 %v662_v41 }
 0x31b   :  { %v929_v42 = vpop.eup %928  ;;  %v705_v14 = vsub.f32 %v1132_v20, %v678_v40 }
 0x31c   :  { %v931_v44 = vpop.eup %930  ;;  %724 = vst [vmem:[%s1236_s5 + $0x38] sm:$0xff] %v708_v10  ;;  %v680_v45 = vmul.f32 0.6931472, %v929_v42  ;;  %v664_v46 = vpop.xlane.xlu1 %663 }
 0x31d   :  { %721 = vst [vmem:[%s1236_s5 + $0x20] sm:$0xff] %v705_v14  ;;  %v690_v47 = vmul.f32 0.6931472, %v931_v44  ;;  %940 = vlog2.f32 %v664_v46  ;;  %v666_v49 = vpop.xlane.xlu0 %665 }
 0x31e   :  { %v706_v16 = vsub.f32 %v1134_v23, %v680_v45  ;;  %942 = vlog2.f32 %v666_v49 }
 0x31f   :  { %v933_v50 = vpop.eup %932  ;;  %v711_v20 = vsub.f32 %v1138_v28, %v690_v47 }
 0x320   :  { %v935_v52 = vpop.eup %934  ;;  %722 = vst [vmem:[%s1236_s5 + $0x28] sm:$0xff] %v706_v16  ;;  %v692_v53 = vmul.f32 0.6931472, %v933_v50  ;;  %v668_v54 = vpop.xlane.xlu1 %667 }
 0x321   :  { %727 = vst [vmem:[%s1236_s5 + $0x50] sm:$0xff] %v711_v20  ;;  %v686_v55 = vmul.f32 0.6931472, %v935_v52  ;;  %944 = vlog2.f32 %v668_v54 }
 0x322   :  { %v712_v57 = vsub.f32 %v1140_v31, %v692_v53 }
 0x323   :  { %v937_v23 = vpop.eup %936  ;;  %v709_v58 = vsub.f32 %v1144_v35, %v686_v55 }
 0x324   :  { %v939_v59 = vpop.eup %938  ;;  %728 = vst [vmem:[%s1236_s5 + $0x58] sm:$0xff] %v712_v57  ;;  %v688_v28 = vmul.f32 0.6931472, %v937_v23 }
 0x325   :  { %725 = vst [vmem:[%s1236_s5 + $0x40] sm:$0xff] %v709_v58  ;;  %v694_v60 = vmul.f32 0.6931472, %v939_v59 }
 0x326   :  { %v710_v61 = vsub.f32 %v1147_v38, %v688_v28 }
 0x327   :  { %v941_v62 = vpop.eup %940  ;;  %v713_v63 = vsub.f32 %v1152_v43, %v694_v60 }
 0x328   :  { %v943_v31 = vpop.eup %942  ;;  %726 = vst [vmem:[%s1236_s5 + $0x48] sm:$0xff] %v710_v61  ;;  %v696_v35 = vmul.f32 0.6931472, %v941_v62 }
 0x329   :  { %729 = vst [vmem:[%s1236_s5 + $0x60] sm:$0xff] %v713_v63  ;;  %v698_v0 = vmul.f32 0.6931472, %v943_v31 }
 0x32a   :  { %v714_v1 = vsub.f32 %v1156_v48, %v696_v35 }
 0x32b   :  { %v945_v3 = vpop.eup %944  ;;  %v715_v5 = vsub.f32 %v1160_v51, %v698_v0 }
 0x32c   :  { %730 = vst [vmem:[%s1236_s5 + $0x68] sm:$0xff] %v714_v1  ;;  %v700_v38 = vmul.f32 0.6931472, %v945_v3 }
 0x32d   :  { %731 = vst [vmem:[%s1236_s5 + $0x70] sm:$0xff] %v715_v5 }
 0x32e   :  { %v716_v43 = vsub.f32 %v1164_v56, %v700_v38 }
 0x330   :  { %732 = vst [vmem:[%s1236_s5 + $0x78] sm:$0xff] %v716_v43 }

</bundles_post_ra>
